<compile_context>
chip_gen: v7x
topology: tpu7x:2x2x1
jax: 0.10.0
libtpu: 0.0.40
codegen_flags: <defaults>
</compile_context>

<pallas_src>
import functools
import math

import jax
import jax.numpy as jnp
from jax.experimental import pallas as pl
from jax.experimental.pallas import tpu as pltpu


def _hash_u32(x):
    """lowbias32 avalanche hash, elementwise on uint32 (wrapping arithmetic)."""
    x = x ^ (x >> 16)
    x = x * jnp.uint32(0x7FEB352D)
    x = x ^ (x >> 15)
    x = x * jnp.uint32(0x846CA68B)
    x = x ^ (x >> 16)
    return x


def _gaussian_noise_kernel(seed_ref, x_ref, o_ref, *, std, tile_rows):
    # Global element index for this tile: unique across the whole tensor and
    # across grid steps -> noise is grid-invariant and never repeats per tile.
    row = jax.lax.broadcasted_iota(jnp.int32, (tile_rows, 128), 0)
    lane = jax.lax.broadcasted_iota(jnp.int32, (tile_rows, 128), 1)
    global_row = row + pl.program_id(0) * tile_rows
    idx = (global_row * 128 + lane).astype(jnp.uint32)

    # Two decorrelated uint32 streams per element, keyed on the seed.
    key = _hash_u32(seed_ref[0].astype(jnp.uint32))
    c0 = idx * jnp.uint32(2) + key
    bits1 = _hash_u32(c0)
    bits2 = _hash_u32(c0 + jnp.uint32(1))

    # 24-bit-mantissa uniforms: u1 in (0, 1] (safe for log), u2 in [0, 1).
    inv24 = jnp.float32(1.0 / (1 << 24))
    u1 = 1.0 - (bits1 >> 8).astype(jnp.int32).astype(jnp.float32) * inv24
    u2 = (bits2 >> 8).astype(jnp.int32).astype(jnp.float32) * inv24

    # Box-Muller -> N(0, 1); scale by std. (EUP: log/sqrt/cos; VPU: mul/add.)
    r = jnp.sqrt(-2.0 * jnp.log(u1))
    theta = jnp.float32(2.0 * math.pi) * u2
    noise = (r * jnp.cos(theta)) * jnp.float32(std)

    o_ref[...] = (x_ref[...].astype(jnp.float32) + noise).astype(o_ref.dtype)


def gaussian_noise(x, seed, std=0.05, max_tile_rows=2048):
    """Equivalent of GaussianNoise.forward: x + noise, noise ~ N(0, std^2)."""
    orig_shape = x.shape
    n = x.size

    # Flatten to a lane-dense (rows, 128) slab, padding to a multiple of
    # 8 * 128 = 1024 elements so block shapes satisfy the (8, 128) rule.
    flat = x.reshape(-1)
    padded = pl.cdiv(n, 1024) * 1024
    if padded != n:
        flat = jnp.pad(flat, (0, padded - n))
    rows = padded // 128
    x2 = flat.reshape(rows, 128)

    # ~1 MiB f32 tiles: 2 in-bufs + 2 out-bufs ~= 4 MiB, fits every generation
    # (incl. v7x 64 MiB VMEM / 32 MiB scoped default) with pipelining headroom.
    tile_r = min(rows, max_tile_rows)
    grid = (pl.cdiv(rows, tile_r),)

    seed_arr = jnp.asarray([seed], dtype=jnp.int32)

    out2 = pl.pallas_call(
        functools.partial(_gaussian_noise_kernel, std=float(std), tile_rows=tile_r),
        out_shape=jax.ShapeDtypeStruct((rows, 128), x.dtype),
        grid=grid,
        in_specs=[
            pl.BlockSpec(memory_space=pltpu.MemorySpace.SMEM),  # seed scalar
            pl.BlockSpec((tile_r, 128), lambda i: (i, 0)),      # x tile
        ],
        out_specs=pl.BlockSpec((tile_r, 128), lambda i: (i, 0)),
        input_output_aliases={1: 0},  # add in place: reuse x2's HBM buffer
        compiler_params=pltpu.CompilerParams(
            dimension_semantics=("parallel",),  # megacore-shard row tiles (v7x)
        ),
    )(seed_arr, x2)

    out = out2.reshape(-1)
    if padded != n:
        out = out[:n]
    return out.reshape(orig_shape)


if __name__ == "__main__":
    # Module defaults: input_shape=(1, 32, 32), std=0.05. Use batch_size=2.
    batch_size = 2
    input_shape = (1, 32, 32)
    std = 0.05

    key = jax.random.PRNGKey(0)
    x = jax.random.normal(key, (batch_size,) + input_shape, dtype=jnp.float32)

    y = gaussian_noise(x, seed=1234, std=std)
    y = jax.block_until_ready(y)

    # Shape/dtype preserved.
    assert y.shape == x.shape and y.dtype == x.dtype

    # Noise has roughly the right scale and near-zero mean.
    diff = y - x
    assert float(jnp.max(jnp.abs(diff))) > 0.0
    measured_std = float(jnp.std(diff))
    assert 0.5 * std < measured_std < 2.0 * std, measured_std
    assert abs(float(jnp.mean(diff))) < 0.4 * std

    # Deterministic for a fixed seed (caller varies seed per step for training).
    y2 = jax.block_until_ready(gaussian_noise(x, seed=1234, std=std))
    assert bool(jnp.array_equal(y, y2))

    print("KERNEL_OK")
</pallas_src>

<mosaic_0001>
module attributes {stable_mosaic.version = 11 : i64} {
  func.func @_gaussian_noise_kernel(%arg0: i32, %arg1: memref<1xi32, #tpu.memory_space<smem>>, %arg2: memref<16x128xf32, #tpu.memory_space<vmem>>, %arg3: memref<16x128xf32, #tpu.memory_space<vmem>>) attributes {dimension_semantics = [#tpu.dimension_semantics<parallel>], iteration_bounds = array<i64: 1>, scalar_prefetch = 0 : i64, scratch_operands = 0 : i64, tpu.core_type = #tpu.core_type<tc>, window_params = [{transform_indices = @transform_0, window_bounds = array<i64: 1>}, {transform_indices = @transform_1, window_bounds = array<i64: 16, 128>}, {transform_indices = @transform_2, window_bounds = array<i64: 16, 128>}]} {
    %0 = tpu.iota {dimensions = array<i32: 0>} : vector<16x128xi32>
    %1 = tpu.iota {dimensions = array<i32: 1>} : vector<16x128xi32>
    %c16_i32 = arith.constant 16 : i32
    %2 = arith.muli %arg0, %c16_i32 : i32
    %3 = vector.broadcast %2 : i32 to vector<16x128xi32>
    %4 = arith.addi %0, %3 : vector<16x128xi32>
    %c128_i32 = arith.constant 128 : i32
    %5 = vector.broadcast %c128_i32 : i32 to vector<16x128xi32>
    %6 = arith.muli %4, %5 : vector<16x128xi32>
    %7 = arith.addi %6, %1 : vector<16x128xi32>
    %c0 = arith.constant 0 : index
    %8 = memref.load %arg1[%c0] : memref<1xi32, #tpu.memory_space<smem>>
    %c16_i32_0 = arith.constant 16 : i32
    %9 = arith.shrui %8, %c16_i32_0 : i32
    %10 = arith.xori %8, %9 : i32
    %c2146121005_i32 = arith.constant 2146121005 : i32
    %11 = arith.muli %10, %c2146121005_i32 : i32
    %c15_i32 = arith.constant 15 : i32
    %12 = arith.shrui %11, %c15_i32 : i32
    %13 = arith.xori %11, %12 : i32
    %c-2073254261_i32 = arith.constant -2073254261 : i32
    %14 = arith.muli %13, %c-2073254261_i32 : i32
    %c16_i32_1 = arith.constant 16 : i32
    %15 = arith.shrui %14, %c16_i32_1 : i32
    %16 = arith.xori %14, %15 : i32
    %c2_i32 = arith.constant 2 : i32
    %17 = vector.broadcast %c2_i32 : i32 to vector<16x128xi32>
    %18 = arith.muli %7, %17 : vector<16x128xi32>
    %19 = vector.broadcast %16 : i32 to vector<16x128xi32>
    %20 = arith.addi %18, %19 : vector<16x128xi32>
    %c16_i32_2 = arith.constant 16 : i32
    %21 = vector.broadcast %c16_i32_2 : i32 to vector<16x128xi32>
    %22 = arith.shrui %20, %21 : vector<16x128xi32>
    %23 = arith.xori %20, %22 : vector<16x128xi32>
    %c2146121005_i32_3 = arith.constant 2146121005 : i32
    %24 = vector.broadcast %c2146121005_i32_3 : i32 to vector<16x128xi32>
    %25 = arith.muli %23, %24 : vector<16x128xi32>
    %c15_i32_4 = arith.constant 15 : i32
    %26 = vector.broadcast %c15_i32_4 : i32 to vector<16x128xi32>
    %27 = arith.shrui %25, %26 : vector<16x128xi32>
    %28 = arith.xori %25, %27 : vector<16x128xi32>
    %c-2073254261_i32_5 = arith.constant -2073254261 : i32
    %29 = vector.broadcast %c-2073254261_i32_5 : i32 to vector<16x128xi32>
    %30 = arith.muli %28, %29 : vector<16x128xi32>
    %c16_i32_6 = arith.constant 16 : i32
    %31 = vector.broadcast %c16_i32_6 : i32 to vector<16x128xi32>
    %32 = arith.shrui %30, %31 : vector<16x128xi32>
    %33 = arith.xori %30, %32 : vector<16x128xi32>
    %c1_i32 = arith.constant 1 : i32
    %34 = vector.broadcast %c1_i32 : i32 to vector<16x128xi32>
    %35 = arith.addi %20, %34 : vector<16x128xi32>
    %c16_i32_7 = arith.constant 16 : i32
    %36 = vector.broadcast %c16_i32_7 : i32 to vector<16x128xi32>
    %37 = arith.shrui %35, %36 : vector<16x128xi32>
    %38 = arith.xori %35, %37 : vector<16x128xi32>
    %c2146121005_i32_8 = arith.constant 2146121005 : i32
    %39 = vector.broadcast %c2146121005_i32_8 : i32 to vector<16x128xi32>
    %40 = arith.muli %38, %39 : vector<16x128xi32>
    %c15_i32_9 = arith.constant 15 : i32
    %41 = vector.broadcast %c15_i32_9 : i32 to vector<16x128xi32>
    %42 = arith.shrui %40, %41 : vector<16x128xi32>
    %43 = arith.xori %40, %42 : vector<16x128xi32>
    %c-2073254261_i32_10 = arith.constant -2073254261 : i32
    %44 = vector.broadcast %c-2073254261_i32_10 : i32 to vector<16x128xi32>
    %45 = arith.muli %43, %44 : vector<16x128xi32>
    %c16_i32_11 = arith.constant 16 : i32
    %46 = vector.broadcast %c16_i32_11 : i32 to vector<16x128xi32>
    %47 = arith.shrui %45, %46 : vector<16x128xi32>
    %48 = arith.xori %45, %47 : vector<16x128xi32>
    %c8_i32 = arith.constant 8 : i32
    %49 = vector.broadcast %c8_i32 : i32 to vector<16x128xi32>
    %50 = arith.shrui %33, %49 : vector<16x128xi32>
    %51 = arith.sitofp %50 : vector<16x128xi32> to vector<16x128xf32>
    %cst = arith.constant 5.96046448E-8 : f32
    %52 = vector.broadcast %cst : f32 to vector<16x128xf32>
    %53 = arith.mulf %51, %52 : vector<16x128xf32>
    %cst_12 = arith.constant 1.000000e+00 : f32
    %54 = vector.broadcast %cst_12 : f32 to vector<16x128xf32>
    %55 = arith.subf %54, %53 : vector<16x128xf32>
    %c8_i32_13 = arith.constant 8 : i32
    %56 = vector.broadcast %c8_i32_13 : i32 to vector<16x128xi32>
    %57 = arith.shrui %48, %56 : vector<16x128xi32>
    %58 = arith.sitofp %57 : vector<16x128xi32> to vector<16x128xf32>
    %cst_14 = arith.constant 5.96046448E-8 : f32
    %59 = vector.broadcast %cst_14 : f32 to vector<16x128xf32>
    %60 = arith.mulf %58, %59 : vector<16x128xf32>
    %61 = math.log %55 : vector<16x128xf32>
    %cst_15 = arith.constant -2.000000e+00 : f32
    %62 = vector.broadcast %cst_15 : f32 to vector<16x128xf32>
    %63 = arith.mulf %62, %61 : vector<16x128xf32>
    %64 = math.sqrt %63 : vector<16x128xf32>
    %cst_16 = arith.constant 6.28318548 : f32
    %65 = vector.broadcast %cst_16 : f32 to vector<16x128xf32>
    %66 = arith.mulf %65, %60 : vector<16x128xf32>
    %67 = math.cos %66 : vector<16x128xf32>
    %68 = arith.mulf %64, %67 : vector<16x128xf32>
    %cst_17 = arith.constant 5.000000e-02 : f32
    %69 = vector.broadcast %cst_17 : f32 to vector<16x128xf32>
    %70 = arith.mulf %68, %69 : vector<16x128xf32>
    %c0_18 = arith.constant 0 : index
    %c0_19 = arith.constant 0 : index
    %71 = vector.load %arg2[%c0_18, %c0_19] : memref<16x128xf32, #tpu.memory_space<vmem>>, vector<16x128xf32>
    %72 = arith.addf %71, %70 : vector<16x128xf32>
    %c0_20 = arith.constant 0 : index
    %c0_21 = arith.constant 0 : index
    %73 = vector.load %arg3[%c0_20, %c0_21] : memref<16x128xf32, #tpu.memory_space<vmem>>, vector<16x128xf32>
    tpu.vector_store %arg3[%c0_20, %c0_21], %72 {strides = array<i32>} : memref<16x128xf32, #tpu.memory_space<vmem>>, vector<16x128xf32>,
    return
  }
  func.func @transform_0(%arg0: i32) -> i32 {
    %c0_i32 = arith.constant 0 : i32
    %c0_i32_0 = arith.constant 0 : i32
    return %c0_i32 : i32
  }
  func.func @transform_1(%arg0: i32) -> (i32, i32) {
    %c0_i32 = arith.constant 0 : i32
    %c0_i32_0 = arith.constant 0 : i32
    return %arg0, %c0_i32 : i32, i32
  }
  func.func @transform_2(%arg0: i32) -> (i32, i32) {
    %c0_i32 = arith.constant 0 : i32
    %c0_i32_0 = arith.constant 0 : i32
    return %arg0, %c0_i32 : i32, i32
  }
}

</mosaic_0001>

<bundles_post_ra>
// kernel: tpu_custom_call.1
= control target key start
LH: loop header
LB: loop body
LE: loop exit
PB: predicated region body
PF: predicated region fallthrough
CT: control target
= control target key end

     0   :  { %8 = vsyncpa [#allocation4], 0  ;;  %s602_s0 = inlined_call_operand.<no memory space> [shape: s32[1], index: 0, kind: input, shape index: {}]   ;;  %s603_s1 = inlined_call_operand.hbm [shape: f32[16,128], index: 1, kind: input, shape index: {}, may-alias: {1,2}]   ;;  %s604_s2 = inlined_call_operand.hbm [shape: f32[16,128], index: 2, kind: output, shape index: {}, may-alias: {1,2}]  }
   0x1   :  { %9 = vsyncpa [#allocation5], 0  ;;  %s447_s9 = smov [#allocation3]   ;;  %s399_s13 = scalar_lea.hbm %s603_s1, 256 }
   0x2   :  { %s17_s10 = sshll.u32 %s447_s9, 4  ;;  %p400_p0 = scmp.ne.s32.totalorder %s603_s1, %s399_s13  ;;  %s18_s10 = int_to_ptr.vmem [resolvable:$true] %s17_s10 }
   0x3   :  { %p403_p1 = scmp.lt.u32.totalorder %s399_s13, %s603_s1 }
   0x5   :  { %p405_p2 = pnand %p403_p1, %p400_p0 }
   0x7   :  { %408 = shalt.err (!%p405_p2)
}
   0x8   :  { %s409_s18 = scalar_lea.vmem %s18_s10, 256  ;;  %p414_p4 = scmp.lt.s32.totalorder %s18_s10, %s18_s10 }
   0x9   :  { %p410_p3 = scmp.ne.s32.totalorder %s18_s10, %s409_s18  ;;  %p415_p5 = scmp.lt.s32.totalorder %s409_s18, %s409_s18 }
   0xb   :  { %p416_p6 = por %p415_p5, %p414_p4 }
   0xd   :  { %p417_p7 = pnand %p416_p6, %p410_p3 }
   0xf   :  { %420 = shalt.err (!%p417_p7)
}
  0x10   :  { %s448_s19 = smov 128   ;;  %s449_s20 = smov 8  }
  0x11   :  { %23 = dma.hbm_to_vmem [thread:$0]  %s603_s1, 256, %s18_s10, [#allocation4], %s448_s19, %s448_s19, %s449_s20  }
  0x12   :  { %443 = dma.done.wait [#allocation4], 256  }
  0x13   :  { %444 = vsyncadd [#allocation4], 4294967040  ;;  %v27_v0 = vlaneseq  ;;  %s41_s25 = sshrl.u32 %s602_s0, 16 }
  0x14   :  { %s42_s28 = sxor.u32 %s41_s25, %s602_s0  ;;  %s456_s0 = smov [#allocation6]  }
  0x15   :  { %v28_v1 = vshrl.u32 %v27_v0, 7  ;;  %v31_v2 = vand.u32 127, %v27_v0  ;;  %s43_s29 = smul.u32 2146121005, %s42_s28  ;;  %s345_s6 = sshll.u32 %s456_s0, 4  ;;  %s346_s6 = int_to_ptr.vmem [resolvable:$true] %s345_s6 }
  0x16   :  { %s421_s7 = scalar_lea.vmem %s346_s6, 256  ;;  %p426_p9 = scmp.lt.s32.totalorder %s346_s6, %s346_s6 }
  0x17   :  { %v29_v3 = vadd.s32 8, %v28_v1  ;;  %v36_v4 = vmul.u32 128, %v28_v1  ;;  %s44_s30 = sshrl.u32 %s43_s29, 15  ;;  %p422_p8 = scmp.ne.s32.totalorder %s346_s6, %s421_s7 }
  0x18   :  { %s45_s3 = sxor.u32 %s44_s30, %s43_s29  ;;  %p427_p10 = scmp.lt.s32.totalorder %s421_s7, %s421_s7 }
  0x19   :  { %v37_v5 = vmul.u32 128, %v29_v3  ;;  %v38_v6 = vadd.s32 %v36_v4, %v31_v2  ;;  %s46_s1 = smul.u32 2221713035, %s45_s3 }
  0x1a   :  { %p428_p11 = por %p427_p10, %p426_p9 }
  0x1b   :  { %v39_v7 = vadd.s32 %v37_v5, %v31_v2  ;;  %s47_s4 = sshrl.u32 %s46_s1, 16  ;;  %v49_v8 = vmul.u32 2, %v38_v6  ;;  %v450_v5 = vmov 683565275  }
  0x1c   :  { %s48_s5 = sxor.u32 %s47_s4, %s46_s1  ;;  %p429_p12 = pnand %p428_p11, %p422_p8 }
  0x1d   :  { %v50_v9 = vmul.u32 2, %v39_v7  ;;  %v51_v10 = vstv %s48_s5  ;;  %v451_v7 = vmov 2475754826  }
  0x1e   :  { %v52_v11 = vadd.s32 %v51_v10, %v49_v8 }
  0x1f   :  { %v53_v12 = vadd.s32 %v51_v10, %v50_v9 }
  0x20   :  { %v70_v13 = vadd.s32 1, %v52_v11  ;;  %v54_v21 = vshrl.u32 %v52_v11, 16 }
  0x21   :  { %v71_v14 = vadd.s32 1, %v53_v12  ;;  %v55_v35 = vshrl.u32 %v53_v12, 16 }
  0x22   :  { %v72_v15 = vshrl.u32 %v70_v13, 16  ;;  %v56_v26 = vxor.u32 %v54_v21, %v52_v11  ;;  %v454_v21 = vmov 920167782  }
  0x23   :  { %v73_v16 = vshrl.u32 %v71_v14, 16  ;;  %v57_v41 = vxor.u32 %v55_v35, %v53_v12 }
  0x24   :  { %v74_v17 = vxor.u32 %v72_v15, %v70_v13  ;;  %v58_v31 = vmul.u32 2146121005, %v56_v26  ;;  %v452_v15 = vmov 2131351028   ;;  %v455_v26 = vmov 1326507024  }
  0x25   :  { %v75_v18 = vxor.u32 %v73_v16, %v71_v14  ;;  %v59_v47 = vmul.u32 2146121005, %v57_v41 }
  0x26   :  { %v76_v19 = vmul.u32 2146121005, %v74_v17  ;;  %v60_v37 = vshrl.u32 %v58_v31, 15 }
  0x27   :  { %v77_v20 = vmul.u32 2146121005, %v75_v18  ;;  %v61_v54 = vshrl.u32 %v59_v47, 15  ;;  %v453_v18 = vmov 2102212464  }
  0x28   :  { %v78_v22 = vshrl.u32 %v76_v19, 15  ;;  %v62_v43 = vxor.u32 %v60_v37, %v58_v31 }
  0x29   :  { %v79_v23 = vshrl.u32 %v77_v20, 15  ;;  %v63_v60 = vxor.u32 %v61_v54, %v59_v47 }
  0x2a   :  { %v80_v24 = vxor.u32 %v78_v22, %v76_v19  ;;  %v64_v49 = vmul.u32 2221713035, %v62_v43 }
  0x2b   :  { %v81_v25 = vxor.u32 %v79_v23, %v77_v20  ;;  %v65_v3 = vmul.u32 2221713035, %v63_v60 }
  0x2c   :  { %v82_v27 = vmul.u32 2221713035, %v80_v24  ;;  %v66_v56 = vshrl.u32 %v64_v49, 16 }
  0x2d   :  { %v83_v28 = vmul.u32 2221713035, %v81_v25  ;;  %v67_v37 = vshrl.u32 %v65_v3, 16 }
  0x2e   :  { %v84_v29 = vshrl.u32 %v82_v27, 16  ;;  %v68_v62 = vxor.u32 %v66_v56, %v64_v49 }
  0x2f   :  { %v85_v30 = vshrl.u32 %v83_v28, 16  ;;  %v69_v56 = vxor.u32 %v67_v37, %v65_v3 }
  0x30   :  { %v86_v32 = vxor.u32 %v84_v29, %v82_v27  ;;  %v88_v9 = vshrl.u32 %v68_v62, 8 }
  0x31   :  { %v87_v33 = vxor.u32 %v85_v30, %v83_v28 }
  0x32   :  { %v96_v34 = vshrl.u32 %v86_v32, 8  ;;  %v90_v41 = vcvt.s32.f32 %v88_v9 }
  0x33   :  { %v97_v36 = vshrl.u32 %v87_v33, 8 }
  0x34   :  { %v98_v38 = vcvt.s32.f32 %v96_v34 }
  0x35   :  { %v99_v39 = vcvt.s32.f32 %v97_v36 }
  0x36   :  { %v100_v40 = vmul.f32 5.9604645e-08, %v98_v38 }
  0x37   :  { %v101_v42 = vmul.f32 5.9604645e-08, %v99_v39 }
  0x38   :  { %v493_v44 = vmul.f32 6.2831855, %v100_v40 }
  0x39   :  { %v495_v45 = vmul.f32 6.2831855, %v101_v42 }
  0x3a   :  { %v127_v46 = vand.u32 2139095040, %v493_v44  ;;  %v124_v50 = vand.u32 2147483647, %v493_v44  ;;  %vm126_vm14 = vcmp.lt.s32.totalorder %v493_v44, 0 }
  0x3b   :  { %v230_v48 = vand.u32 2139095040, %v495_v45  ;;  %v227_v11 = vand.u32 2147483647, %v495_v45 }
  0x3c   :  { %v128_v51 = vshrl.u32 %v127_v46, 23  ;;  %v131_v57 = vand.u32 8388607, %v124_v50  ;;  %vm554_vm13 = vcmp.le.f32.partialorder %v124_v50, 0.7853982 }
  0x3d   :  { %v231_v52 = vshrl.u32 %v230_v48, 23  ;;  %v234_v46 = vand.u32 8388607, %v227_v11 }
  0x3e   :  { %v357_v53 = vadd.s32 4294967169, %v128_v51  ;;  %v132_v63 = vor.u32 8388608, %v131_v57 }
  0x3f   :  { %v361_v55 = vadd.s32 4294967169, %v231_v52 }
  0x40   :  { %v134_v58 = vadd.s32 1, %v357_v53  ;;  %v502_v10 = vshll.u32 %v132_v63, 8 }
  0x41   :  { %v237_v59 = vadd.s32 1, %v361_v55 }
  0x42   :  { %vm135_vm0 = vcmp.gt.s32.totalorder %v134_v58, 0 }
  0x43   :  { %v136_v61 = vsel %vm135_vm0, %v134_v58, 0  ;;  %vm238_vm1 = vcmp.gt.s32.totalorder %v237_v59, 0 }
  0x44   :  { %v138_v0 = vand.u32 31, %v136_v61  ;;  %v239_v1 = vsel %vm238_vm1, %v237_v59, 0  ;;  %v137_v4 = vshrl.u32 %v136_v61, 5  ;;  %v235_v61 = vor.u32 8388608, %v234_v46 }
  0x45   :  { %v505_v12 = vand.u32 31, %v239_v1  ;;  %v240_v62 = vshrl.u32 %v239_v1, 5  ;;  %vm569_vm1 = vcmp.le.f32.partialorder %v227_v11, 0.7853982 }
  0x46   :  { %v139_v2 = vsub.s32 32, %v138_v0  ;;  %v141_v6 = vshll.u32 %v450_v5, %v138_v0  ;;  %v144_v8 = vshll.u32 %v451_v7, %v138_v0  ;;  %v147_v17 = vshll.u32 %v452_v15, %v138_v0 }
  0x47   :  { %v150_v20 = vshll.u32 %v453_v18, %v138_v0  ;;  %v153_v23 = vshll.u32 %v454_v21, %v138_v0  ;;  %vm156_vm2 = vcmp.lt.s32.totalorder %v137_v4, 1  ;;  %vm157_vm3 = vcmp.lt.s32.totalorder %v137_v4, 2 }
  0x48   :  { %v140_v13 = vshrl.u32 %v450_v5, %v139_v2  ;;  %v142_v14 = vshrl.u32 %v451_v7, %v139_v2  ;;  %v145_v16 = vshrl.u32 %v452_v15, %v139_v2  ;;  %v148_v19 = vshrl.u32 %v453_v18, %v139_v2 }
  0x49   :  { %v151_v22 = vshrl.u32 %v454_v21, %v139_v2  ;;  %v154_v27 = vshrl.u32 %v455_v26, %v139_v2  ;;  %vm158_vm4 = vcmp.lt.s32.totalorder %v137_v4, 3  ;;  %vm159_vm5 = vcmp.lt.s32.totalorder %v137_v4, 4 }
  0x4a   :  { %v143_v24 = vor.u32 %v142_v14, %v141_v6  ;;  %v146_v25 = vor.u32 %v145_v16, %v144_v8  ;;  %v149_v28 = vor.u32 %v148_v19, %v147_v17  ;;  %v242_v36 = vsub.s32 32, %v505_v12 }
  0x4b   :  { %v152_v29 = vor.u32 %v151_v22, %v150_v20  ;;  %v155_v30 = vor.u32 %v154_v27, %v153_v23  ;;  %v244_v54 = vshll.u32 %v450_v5, %v505_v12  ;;  %v247_v57 = vshll.u32 %v451_v7, %v505_v12 }
  0x4c   :  { %v160_v31 = vsel %vm156_vm2, %v140_v13, %v143_v24  ;;  %v164_v32 = vsel %vm156_vm2, %v143_v24, %v146_v25  ;;  %v161_v33 = vsel %vm159_vm5, %v149_v28, 2102212464  ;;  %v168_v35 = vsel %vm156_vm2, %v146_v25, %v149_v28 }
  0x4d   :  { %v165_v34 = vsel %vm159_vm5, %v152_v29, 920167782  ;;  %v162_v38 = vsel %vm158_vm4, %v146_v25, %v161_v33  ;;  %v169_v40 = vsel %vm159_vm5, %v155_v30, 1326507024  ;;  %v245_v55 = vshrl.u32 %v451_v7, %v242_v36 }
  0x4e   :  { %v166_v39 = vsel %vm158_vm4, %v149_v28, %v165_v34  ;;  %v170_v43 = vsel %vm158_vm4, %v152_v29, %v169_v40  ;;  %v163_v47 = vsel %vm157_vm3, %v160_v31, %v162_v38  ;;  %v248_v58 = vshrl.u32 %v452_v15, %v242_v36 }
  0x4f   :  { %v167_v42 = vsel %vm157_vm3, %v164_v32, %v166_v39  ;;  %v171_v48 = vsel %vm157_vm3, %v168_v35, %v170_v43  ;;  %v250_v59 = vshll.u32 %v452_v15, %v505_v12  ;;  %v179_v60 = vmul.u32 %v502_v10, %v163_v47 }
  0x50   :  { %v514_v49 = vmul.u32.u64.low %v502_v10, %v167_v42  ;;  %v515_v51 = vmul.u32.u64.high %v502_v10, %v167_v42, %v514_v49  ;;  %v519_v52 = vmul.u32.u64.low %v502_v10, %v171_v48  ;;  %v520_v53 = vmul.u32.u64.high %v502_v10, %v171_v48, %v519_v52 }
  0x51   :  { %v251_v63 = vshrl.u32 %v453_v18, %v242_v36  ;;  %v92_v0 = vmul.f32 5.9604645e-08, %v90_v41  ;;  %v243_v4 = vshrl.u32 %v450_v5, %v242_v36  ;;  %v253_v6 = vshll.u32 %v453_v18, %v505_v12 }
  0x52   :  { %v182_v2 = vadd.s32 1, %v515_v51  ;;  %vm181_vm6 = vc.u32 %v520_v53, %v514_v49  ;;  %v246_v3 = vor.u32 %v245_v55, %v244_v54  ;;  %v249_v8 = vor.u32 %v248_v58, %v247_v57 }
  0x53   :  { %v252_v7 = vor.u32 %v251_v63, %v250_v59  ;;  %v254_v13 = vshrl.u32 %v454_v21, %v242_v36  ;;  %v256_v10 = vshll.u32 %v454_v21, %v505_v12  ;;  %v257_v14 = vshrl.u32 %v455_v26, %v242_v36 }
  0x54   :  { %v183_v9 = vsel %vm181_vm6, %v182_v2, %v515_v51  ;;  %vm259_vm7 = vcmp.lt.s32.totalorder %v240_v62, 1  ;;  %vm260_vm8 = vcmp.lt.s32.totalorder %v240_v62, 2  ;;  %v275_v15 = vshll.u32 %v235_v61, 8 }
  0x55   :  { %v184_v1 = vadd.s32 %v183_v9, %v179_v60  ;;  %v255_v16 = vor.u32 %v254_v13, %v253_v6  ;;  %v258_v5 = vor.u32 %v257_v14, %v256_v10  ;;  %vm261_vm9 = vcmp.lt.s32.totalorder %v240_v62, 3 }
  0x56   :  { %vm262_vm10 = vcmp.lt.s32.totalorder %v240_v62, 4  ;;  %v267_v19 = vsel %vm259_vm7, %v246_v3, %v249_v8  ;;  %v271_v20 = vsel %vm259_vm7, %v249_v8, %v252_v7  ;;  %v263_v22 = vsel %vm259_vm7, %v243_v4, %v246_v3 }
  0x57   :  { %v185_v17 = vadd.s32 536870912, %v184_v1  ;;  %v264_v18 = vsel %vm262_vm10, %v252_v7, 2102212464  ;;  %v268_v23 = vsel %vm262_vm10, %v255_v16, 920167782  ;;  %v89_v26 = vshrl.u32 %v69_v56, 8 }
  0x58   :  { %v272_v24 = vsel %vm262_vm10, %v258_v5, 1326507024  ;;  %v265_v27 = vsel %vm261_vm9, %v249_v8, %v264_v18  ;;  %v269_v12 = vsel %vm261_vm9, %v252_v7, %v268_v23  ;;  %v94_v28 = vsub.f32 1.0, %v92_v0 }
  0x59   :  { %v532_v25 = vshrl.u32 %v185_v17, 30  ;;  %v273_v21 = vsel %vm261_vm9, %v255_v16, %v272_v24  ;;  %v270_v29 = vsel %vm260_vm8, %v267_v19, %v269_v12  ;;  %v266_v34 = vsel %vm260_vm8, %v263_v22, %v265_v27 }
  0x5a   :  { %v274_v30 = vsel %vm260_vm8, %v271_v20, %v273_v21  ;;  %v541_v35 = vmul.u32.u64.low %v275_v15, %v270_v29  ;;  %v542_v36 = vmul.u32.u64.high %v275_v15, %v270_v29, %v541_v35  ;;  %v91_v38 = vcvt.s32.f32 %v89_v26 }
  0x5b   :  { %v187_v31 = vshll.u32 %v532_v25, 30  ;;  %v537_v32 = vmul.u32.u64.low %v275_v15, %v274_v30  ;;  %v538_v33 = vmul.u32.u64.high %v275_v15, %v274_v30, %v537_v32  ;;  %383 = vlog2.f32 %v94_v28 }
  0x5c   :  { %v282_v40 = vmul.u32 %v275_v15, %v266_v34  ;;  %v285_v41 = vadd.s32 1, %v542_v36  ;;  %v93_v43 = vmul.f32 5.9604645e-08, %v91_v38  ;;  %v180_v55 = vadd.s32 %v514_v49, %v520_v53 }
  0x5d   :  { %v188_v37 = vsub.s32 %v184_v1, %v187_v31  ;;  %vm284_vm11 = vc.u32 %v538_v33, %v541_v35  ;;  %v210_v17 = vsub.s32 4, %v532_v25  ;;  %v283_v18 = vadd.s32 %v541_v35, %v538_v33 }
  0x5e   :  { %v286_v46 = vsel %vm284_vm11, %v285_v41, %v542_v36  ;;  %v95_v54 = vsub.f32 1.0, %v93_v43  ;;  %vm229_vm2 = vcmp.lt.s32.totalorder %v495_v45, 0  ;;  %vm216_vm7 = vweird.f32 %v493_v44 }
  0x5f   :  { %v190_v39 = vsub.s32 0, %v188_v37  ;;  %v287_v48 = vadd.s32 %v286_v46, %v282_v40  ;;  %v211_v12 = vsel %vm126_vm14, %v210_v17, %v532_v25 }
  0x60   :  { %385 = vlog2.f32 %v95_v54  ;;  %v213_v30 = vsel %vm554_vm13, 0, %v211_v12 }
  0x61   :  { %v358_v42 = vmin.u32 %v190_v39, %v188_v37  ;;  %v288_v52 = vadd.s32 536870912, %v287_v48  ;;  %v217_v35 = vand.u32 3, %v213_v30 }
  0x63   :  { %v192_v47 = vclz %v358_v42  ;;  %v549_v56 = vshrl.u32 %v288_v52, 30  ;;  %vm222_vm3 = vcmp.eq.s32.totalorder %v217_v35, 2  ;;  %vm219_vm5 = vcmp.eq.s32.totalorder %v217_v35, 0 }
  0x64   :  { %vm218_vm6 = vcmp.lt.s32.totalorder %v217_v35, 2 }
  0x65   :  { %v359_v51 = vadd.s32 4294967294, %v192_v47  ;;  %v384_v57 = vpop.eup %383  ;;  %v290_v62 = vshll.u32 %v549_v56, 30  ;;  %v313_v42 = vsub.s32 4, %v549_v56 }
  0x66   :  { %v103_v63 = vmul.f32 0.6931472, %v384_v57 }
  0x67   :  { %vm360_vm12 = vcmp.lt.s32.totalorder %v359_v51, 0  ;;  %v291_v4 = vsub.s32 %v287_v48, %v290_v62  ;;  %v314_v57 = vsel %vm229_vm2, %v313_v42, %v549_v56  ;;  %v334_v62 = vld [vmem:[#allocation3] sm:$0xff] }
  0x68   :  { %v195_v58 = vsel %vm360_vm12, 0, %v359_v51  ;;  %v106_v7 = vmul.f32 -2.0, %v103_v63 }
  0x69   :  { %v196_v59 = vsub.s32 32, %v195_v58  ;;  %v197_v60 = vshll.u32 %v188_v37, %v195_v58  ;;  %v200_v61 = vsub.s32 4294967266, %v195_v58  ;;  %v293_v8 = vsub.s32 0, %v291_v4 }
  0x6a   :  { %387 = vrsqrt.f32 %v106_v7  ;;  %v386_v15 = vpop.eup %385  ;;  %vm110_vm0 = vcmp.eq.f32.partialorder %v106_v7, inf  ;;  %v113_v40 = vand.u32 2147483648, %v106_v7  ;;  %vm112_vm4 = vcmp.eq.f32.partialorder %v106_v7, 0.0 }
  0x6b   :  { %v198_v0 = vshrl.u32 %v180_v55, %v196_v59  ;;  %v201_v2 = vadd.s32 127, %v200_v61  ;;  %v362_v9 = vmin.u32 %v293_v8, %v291_v4  ;;  %v105_v27 = vmul.f32 0.6931472, %v386_v15  ;;  %v335_v15 = vld [vmem:[#allocation3 + $0x8] sm:$0xff] }
  0x6d   :  { %v199_v6 = vor.u32 %v198_v0, %v197_v60  ;;  %v202_v3 = vshll.u32 %v201_v2, 23  ;;  %v295_v10 = vclz %v362_v9  ;;  %v107_v32 = vmul.f32 -2.0, %v105_v27 }
  0x6e   :  { %v316_v60 = vsel %vm569_vm1, 0, %v314_v57 }
  0x6f   :  { %v203_v49 = vor.u32 4788187, %v202_v3  ;;  %v206_v53 = vcvt.s32.f32 %v199_v6  ;;  %v363_v1 = vadd.s32 4294967294, %v295_v10  ;;  %v320_v0 = vand.u32 3, %v316_v60 }
  0x70   :  { %vm117_vm8 = vcmp.eq.f32.partialorder %v107_v32, inf  ;;  %v120_v3 = vand.u32 2147483648, %v107_v32  ;;  %vm119_vm10 = vcmp.eq.f32.partialorder %v107_v32, 0.0 }
  0x71   :  { %v204_v13 = vand.u32 2147483647, %v203_v49  ;;  %vm364_vm15 = vcmp.lt.s32.totalorder %v363_v1, 0  ;;  %vm325_vm9 = vcmp.eq.s32.totalorder %v320_v0, 2  ;;  %vm322_vm11 = vcmp.eq.s32.totalorder %v320_v0, 0 }
  0x72   :  { %v298_v19 = vsel %vm364_vm15, 0, %v363_v1  ;;  %vm321_vm12 = vcmp.lt.s32.totalorder %v320_v0, 2 }
  0x73   :  { %v207_v14 = vmul.f32 %v206_v53, %v204_v13  ;;  %v299_v22 = vsub.s32 32, %v298_v19  ;;  %v300_v23 = vshll.u32 %v291_v4, %v298_v19  ;;  %v303_v24 = vsub.s32 4294967266, %v298_v19 }
  0x74   :  { %v388_v31 = vpop.eup %387 }
  0x75   :  { %v208_v5 = vxor.u32 2147483648, %v207_v14  ;;  %v301_v21 = vshrl.u32 %v283_v18, %v299_v22  ;;  %v304_v26 = vadd.s32 127, %v303_v24  ;;  %v109_v37 = vmul.f32 %v388_v31, %v106_v7 }
  0x77   :  { %v209_v20 = vsel %vm126_vm14, %v208_v5, %v207_v14  ;;  %v302_v28 = vor.u32 %v301_v21, %v300_v23  ;;  %v305_v29 = vshll.u32 %v304_v26, 23  ;;  %v111_v46 = vsel %vm110_vm0, %v106_v7, %v109_v37 }
  0x78   :  { %v212_v50 = vsel %vm554_vm13, %v493_v44, %v209_v20  ;;  %v114_v54 = vsel %vm112_vm4, %v113_v40, %v111_v46  ;;  %vm319_vm13 = vweird.f32 %v495_v45 }
  0x79   :  { %389 = vcosq.f32 %v212_v50  ;;  %v306_v33 = vor.u32 4788187, %v305_v29  ;;  %v309_v34 = vcvt.s32.f32 %v302_v28 }
  0x7a   :  { %391 = vsinq.f32 %v212_v50 }
  0x7b   :  { %v307_v36 = vand.u32 2147483647, %v306_v33  ;;  %393 = vrsqrt.f32 %v107_v32 }
  0x7d   :  { %v310_v38 = vmul.f32 %v309_v34, %v307_v36 }
  0x7f   :  { %v311_v41 = vxor.u32 2147483648, %v310_v38 }
  0x81   :  { %v312_v11 = vsel %vm229_vm2, %v311_v41, %v310_v38 }
  0x82   :  { %v315_v52 = vsel %vm569_vm1, %v495_v45, %v312_v11 }
  0x83   :  { %v390_v39 = vpop.eup %389  ;;  %395 = vcosq.f32 %v315_v52 }
  0x84   :  { %v392_v43 = vpop.eup %391  ;;  %v223_v47 = vxor.u32 2147483648, %v390_v39  ;;  %397 = vsinq.f32 %v315_v52 }
  0x85   :  { %v220_v48 = vxor.u32 2147483648, %v392_v43  ;;  %v394_v44 = vpop.eup %393 }
  0x86   :  { %v224_v51 = vsel %vm222_vm3, %v223_v47, %v392_v43  ;;  %v116_v2 = vmul.f32 %v394_v44, %v107_v32 }
  0x87   :  { %v221_v55 = vsel %vm219_vm5, %v390_v39, %v220_v48 }
  0x88   :  { %v225_v58 = vsel %vm218_vm6, %v221_v55, %v224_v51  ;;  %v118_v8 = vsel %vm117_vm8, %v107_v32, %v116_v2 }
  0x89   :  { %v226_v59 = vsel %vm216_vm7, nan, %v225_v58  ;;  %v121_v9 = vsel %vm119_vm10, %v120_v3, %v118_v8 }
  0x8a   :  { %v330_v61 = vmul.f32 %v226_v59, %v114_v54 }
  0x8c   :  { %v332_v63 = vmul.f32 0.05, %v330_v61 }
  0x8d   :  { %v396_v6 = vpop.eup %395 }
  0x8e   :  { %v336_v4 = vadd.f32 %v334_v62, %v332_v63  ;;  %v398_v56 = vpop.eup %397  ;;  %v326_v7 = vxor.u32 2147483648, %v396_v6 }
  0x8f   :  { %v323_v49 = vxor.u32 2147483648, %v398_v56 }
  0x90   :  { %338 = vst [vmem:[#allocation6] sm:$0xff] %v336_v4  ;;  %v327_v53 = vsel %vm325_vm9, %v326_v7, %v398_v56 }
  0x91   :  { %v324_v13 = vsel %vm322_vm11, %v396_v6, %v323_v49 }
  0x92   :  { %v328_v10 = vsel %vm321_vm12, %v324_v13, %v327_v53 }
  0x93   :  { %v329_v14 = vsel %vm319_vm13, nan, %v328_v10 }
  0x94   :  { %v331_v1 = vmul.f32 %v329_v14, %v121_v9 }
  0x96   :  { %v333_v16 = vmul.f32 0.05, %v331_v1 }
  0x98   :  { %v337_v5 = vadd.f32 %v335_v15, %v333_v16 }
  0x9a   :  { %339 = vst [vmem:[#allocation6 + $0x8] sm:$0xff] %v337_v5 }
  0x9b   :  { %432 = shalt.err (!%p429_p12)
}
  0x9c   :  { %s433_s10 = scalar_lea.hbm %s604_s2, 256 }
  0x9d   :  { %p434_p13 = scmp.ne.s32.totalorder %s604_s2, %s433_s10  ;;  %p437_p0 = scmp.lt.u32.totalorder %s433_s10, %s604_s2 }
  0x9f   :  { %p439_p1 = pnand %p437_p0, %p434_p13 }
  0xa1   :  { %442 = shalt.err (!%p439_p1)
}
  0xa2   :  { %351 = dma.vmem_to_hbm [thread:$0]  %s346_s6, 256, %s604_s2, [#allocation5], %s448_s19, %s448_s19, %s449_s20  }
  0xa3   :  { %445 = dma.done.wait [#allocation5], 256  }
  0xa4   :  { %446 = vsyncadd [#allocation5], 4294967040 }
  0xa5   :  { %355 = vsyncpa [#allocation4], 1 }
  0xa6   :  { %356 = vsyncpa [#allocation5], 1 }

</bundles_post_ra>
